<compile_context>
chip_gen: v7x
topology: tpu7x:2x2x1
jax: 0.10.0
libtpu: 0.0.40
codegen_flags: <defaults>
</compile_context>

<pallas_src>
import numpy as np
import jax
import jax.numpy as jnp
from jax import lax
from jax.experimental import pallas as pl
from jax.experimental.pallas import tpu as pltpu


def _round_up(a, b):
    return (a + b - 1) // b * b


def _vmem_limit(need_bytes):
    # block footprint (double-buffered) + headroom, clamped to v7x's 64 MiB.
    return int(min(max(need_bytes + (4 << 20), 16 << 20), 64 << 20))


def _ln_noaffine(v, eps=1e-5):
    mu = jnp.mean(v, axis=-1, keepdims=True)
    var = jnp.mean(jnp.square(v - mu), axis=-1, keepdims=True)
    return (v - mu) * lax.rsqrt(var + eps)


# ------------------------------ fused kernel ---------------------------------
def pooled_mask_embed_kernel(x_ref, m_ref, dec_ref,
                             wproj_ref, bproj_ref,
                             w1_ref, b1_ref, w2_ref, b2_ref, w3_ref, b3_ref,
                             pooled_out_ref, embed_out_ref,
                             acc_ref, cnt_ref):
    # x_ref:          [1, C, tk]   mask_features tile (channels-major)
    # m_ref:          [1, Q, tk]   pred_masks tile (logits)
    # dec_ref:        [1, Q, C]    decoder_output (DMA'd once per batch element)
    # w*/b*:          weights (constant index_map -> resident across the grid)
    # pooled_out_ref: [1, Q, C]    output (resident across the HW axis)
    # embed_out_ref:  [1, Q, P]    output (resident across the HW axis)
    # acc_ref:        [Q, C]       raw pooled-sum accumulator (VMEM scratch)
    # cnt_ref:        [Q, 1]       per-query active-pixel count (VMEM scratch)
    k = pl.program_id(1)

    @pl.when(k == 0)
    def _init():
        acc_ref[...] = jnp.zeros_like(acc_ref)
        cnt_ref[...] = jnp.zeros_like(cnt_ref)
        pooled_out_ref[...] = jnp.zeros_like(pooled_out_ref)
        embed_out_ref[...] = jnp.zeros_like(embed_out_ref)

    # sigmoid(z) > 0.5  <=>  z > 0  -> no EUP sigmoid needed (exact rewrite).
    m = (m_ref[0] > 0.0).astype(jnp.float32)           # [Q, tk]
    x = x_ref[0]                                        # [C, tk]

    cnt_ref[...] += jnp.sum(m, axis=-1, keepdims=True)  # XLU lane reduce
    # NT contraction over HW (both operands lane-dense in HW) on the MXU.
    acc_ref[...] += lax.dot_general(
        m, x, (((1,), (1,)), ((), ())), preferred_element_type=jnp.float32)

    @pl.when(k == pl.num_programs(1) - 1)
    def _finalize():
        # normalize after the matmul: Q*C multiplies instead of Q*HW divides.
        pooled = acc_ref[...] * (1.0 / (cnt_ref[...] + 1e-8))      # [Q, C]

        # pool_proj: LayerNorm (affine folded into wproj/bproj) + Linear, + res
        h = _ln_noaffine(pooled)
        h = jnp.dot(h, wproj_ref[...],
                    preferred_element_type=jnp.float32) + bproj_ref[...]
        h = h + dec_ref[0]
        pooled_out_ref[0] = h

        # mask_embed: LayerNorm (affine folded into w1/b1) + 3-layer MLP (ReLU)
        g = _ln_noaffine(h)
        g = jnp.maximum(jnp.dot(g, w1_ref[...],
                                preferred_element_type=jnp.float32)
                        + b1_ref[...], 0.0)
        g = jnp.maximum(jnp.dot(g, w2_ref[...],
                                preferred_element_type=jnp.float32)
                        + b2_ref[...], 0.0)
        embed_out_ref[0] = (jnp.dot(g, w3_ref[...],
                                    preferred_element_type=jnp.float32)
                            + b3_ref[...])


# --------------------------------- wrapper -----------------------------------
def pooled_mask_embed(decoder_output, input_mask_embed, mask_features,
                      pred_logits, pred_masks, params, temperature=0.07):
    # input_mask_embed / pred_logits accepted for signature fidelity; unused by
    # the reference forward pass.
    del input_mask_embed, pred_logits

    B, Q, C = decoder_output.shape
    _, _, H, W = mask_features.shape
    HW = H * W
    P = params["w3"].shape[1]

    # ---- layout: keep x channels-major (free reshape, no wrapper transpose) --
    x_chw = mask_features.reshape(B, C, HW)              # [B, C, HW]
    masks = pred_masks.reshape(B, Q, HW)                 # [B, Q, HW]

    # HW reduction tile: big as possible but cap the per-block footprint so the
    # double-buffered x/m DMAs fit VMEM even for large C / Q.
    tk_cap = max(128, ((2 << 20) // (4 * (C + Q))) // 128 * 128)
    tk = min(_round_up(HW, 128), 2048, tk_cap)
    HW_pad = _round_up(HW, tk)
    if HW_pad != HW:
        # zero-padded mask logits are <= 0 -> contribute nothing (exact)
        x_chw = jnp.pad(x_chw, ((0, 0), (0, 0), (0, HW_pad - HW)))
        masks = jnp.pad(masks, ((0, 0), (0, 0), (0, HW_pad - HW)))
    n_k = HW_pad // tk

    # ---- fold LayerNorm affines into the following Linear layers (exact) -----
    #   LN(v; w, b) @ W + B = LN0(v) @ (diag(w) W) + (b @ W + B)
    wproj_f = params["ln1_w"][0][:, None] * params["wproj"]           # [C, C]
    bproj_f = params["ln1_b"] @ params["wproj"] + params["bproj"]     # [1, C]
    w1_f = params["ln2_w"][0][:, None] * params["w1"]                 # [C, C]
    b1_f = params["ln2_b"] @ params["w1"] + params["b1"]              # [1, C]

    in_bytes = 4 * (C * tk + Q * tk + Q * C)
    w_bytes = 4 * (3 * C * C + C * P + 3 * C + P)
    out_bytes = 4 * (Q * C + Q * P)
    scratch_bytes = 4 * (Q * C + Q)
    vmem = _vmem_limit(2 * (in_bytes + w_bytes + out_bytes) + scratch_bytes)

    const2d = lambda b, k: (0, 0)

    pooled_proj, embed = pl.pallas_call(
        pooled_mask_embed_kernel,
        out_shape=(
            jax.ShapeDtypeStruct((B, Q, C), jnp.float32),
            jax.ShapeDtypeStruct((B, Q, P), jnp.float32),
        ),
        grid_spec=pltpu.PrefetchScalarGridSpec(
            num_scalar_prefetch=0,
            grid=(B, n_k),
            in_specs=[
                pl.BlockSpec((1, C, tk), lambda b, k: (b, 0, k)),   # x  [B,C,HW]
                pl.BlockSpec((1, Q, tk), lambda b, k: (b, 0, k)),   # masks
                pl.BlockSpec((1, Q, C), lambda b, k: (b, 0, 0)),    # decoder_out
                pl.BlockSpec((C, C), const2d),                      # wproj (LN1 folded)
                pl.BlockSpec((1, C), const2d),                      # bproj (LN1 folded)
                pl.BlockSpec((C, C), const2d),                      # w1    (LN2 folded)
                pl.BlockSpec((1, C), const2d),                      # b1
                pl.BlockSpec((C, C), const2d),                      # w2
                pl.BlockSpec((1, C), const2d),                      # b2
                pl.BlockSpec((C, P), const2d),                      # w3
                pl.BlockSpec((1, P), const2d),                      # b3
            ],
            out_specs=[
                pl.BlockSpec((1, Q, C), lambda b, k: (b, 0, 0)),
                pl.BlockSpec((1, Q, P), lambda b, k: (b, 0, 0)),
            ],
            scratch_shapes=[
                pltpu.VMEM((Q, C), jnp.float32),
                pltpu.VMEM((Q, 1), jnp.float32),
            ],
        ),
        compiler_params=pltpu.CompilerParams(
            dimension_semantics=("parallel", "arbitrary"),
            vmem_limit_bytes=vmem),
    )(x_chw, masks, decoder_output,
      wproj_f, bproj_f, w1_f, b1_f,
      params["w2"], params["b2"], params["w3"], params["b3"])

    # logit_scale = clamp(exp(log(1/T)), max=100) -- scalar, plain JAX.
    logit_scale = jnp.minimum(jnp.exp(params["logit_scale"]), 100.0)

    return {
        "mask_embed": embed,
        "mask_pooled_features": pooled_proj,
        "logit_scale": logit_scale,
    }


# --------------------------- pure-JAX reference -------------------------------
def _ref_forward(decoder_output, mask_features, pred_masks, params):
    m = jax.nn.sigmoid(pred_masks)
    m = (m > 0.5).astype(jnp.float32)
    denorm = m.sum(axis=(-1, -2), keepdims=True) + 1e-8
    pooled = jnp.einsum("bchw,bqhw->bqc", mask_features, m / denorm)

    def ln(v, w, b):
        mu = v.mean(-1, keepdims=True)
        var = ((v - mu) ** 2).mean(-1, keepdims=True)
        return (v - mu) / jnp.sqrt(var + 1e-5) * w + b

    h = ln(pooled, params["ln1_w"][0], params["ln1_b"][0])
    h = h @ params["wproj"] + params["bproj"][0]
    h = h + decoder_output
    g = ln(h, params["ln2_w"][0], params["ln2_b"][0])
    g = jnp.maximum(g @ params["w1"] + params["b1"][0], 0.0)
    g = jnp.maximum(g @ params["w2"] + params["b2"][0], 0.0)
    g = g @ params["w3"] + params["b3"][0]
    return h, g


def make_params(key, hidden_dim, mask_dim, projection_dim, temperature=0.07):
    assert mask_dim == hidden_dim  # required by the reference forward shapes
    ks = jax.random.split(key, 8)
    s = 0.05
    return {
        "ln1_w": jnp.ones((1, hidden_dim), jnp.float32),
        "ln1_b": jnp.zeros((1, hidden_dim), jnp.float32),
        "wproj": s * jax.random.normal(ks[0], (hidden_dim, hidden_dim), jnp.float32),
        "bproj": s * jax.random.normal(ks[1], (1, hidden_dim), jnp.float32),
        "ln2_w": jnp.ones((1, mask_dim), jnp.float32),
        "ln2_b": jnp.zeros((1, mask_dim), jnp.float32),
        "w1": s * jax.random.normal(ks[2], (mask_dim, hidden_dim), jnp.float32),
        "b1": s * jax.random.normal(ks[3], (1, hidden_dim), jnp.float32),
        "w2": s * jax.random.normal(ks[4], (hidden_dim, hidden_dim), jnp.float32),
        "b2": s * jax.random.normal(ks[5], (1, hidden_dim), jnp.float32),
        "w3": s * jax.random.normal(ks[6], (hidden_dim, projection_dim), jnp.float32),
        "b3": s * jax.random.normal(ks[7], (1, projection_dim), jnp.float32),
        "logit_scale": jnp.asarray(np.log(1.0 / temperature), jnp.float32),
    }


if __name__ == "__main__":
    B, Q, C, H, W = 2, 8, 32, 16, 16
    hidden_dim = mask_dim = C
    projection_dim = 32
    num_classes = 5  # pred_logits K+1 (unused by forward)

    key = jax.random.PRNGKey(0)
    k = jax.random.split(key, 6)
    decoder_output = jax.random.normal(k[0], (B, Q, C), jnp.float32)
    input_mask_embed = jax.random.normal(k[1], (B, Q, C), jnp.float32)
    mask_features = jax.random.normal(k[2], (B, C, H, W), jnp.float32)
    pred_logits = jax.random.normal(k[3], (B, Q, num_classes), jnp.float32)
    pred_masks = jax.random.normal(k[4], (B, Q, H, W), jnp.float32)
    params = make_params(k[5], hidden_dim, mask_dim, projection_dim)

    out = pooled_mask_embed(decoder_output, input_mask_embed, mask_features,
                            pred_logits, pred_masks, params)
    jax.block_until_ready(out)

    # sanity check vs. pure-JAX reference
    ref_pooled, ref_embed = _ref_forward(decoder_output, mask_features,
                                         pred_masks, params)
    np.testing.assert_allclose(np.asarray(out["mask_pooled_features"]),
                               np.asarray(ref_pooled), rtol=1e-4, atol=1e-4)
    np.testing.assert_allclose(np.asarray(out["mask_embed"]),
                               np.asarray(ref_embed), rtol=1e-4, atol=1e-4)
    assert float(out["logit_scale"]) <= 100.0

    print("KERNEL_OK")
</pallas_src>

<mosaic_0001>
module attributes {stable_mosaic.version = 11 : i64} {
  func.func @pooled_mask_embed_kernel(%arg0: i32, %arg1: i32, %arg2: memref<1x32x256xf32, #tpu.memory_space<vmem>>, %arg3: memref<1x8x256xf32, #tpu.memory_space<vmem>>, %arg4: memref<1x8x32xf32, #tpu.memory_space<vmem>>, %arg5: memref<32x32xf32, #tpu.memory_space<vmem>>, %arg6: memref<1x32xf32, #tpu.memory_space<vmem>>, %arg7: memref<32x32xf32, #tpu.memory_space<vmem>>, %arg8: memref<1x32xf32, #tpu.memory_space<vmem>>, %arg9: memref<32x32xf32, #tpu.memory_space<vmem>>, %arg10: memref<1x32xf32, #tpu.memory_space<vmem>>, %arg11: memref<32x32xf32, #tpu.memory_space<vmem>>, %arg12: memref<1x32xf32, #tpu.memory_space<vmem>>, %arg13: memref<1x8x32xf32, #tpu.memory_space<vmem>>, %arg14: memref<1x8x32xf32, #tpu.memory_space<vmem>>, %arg15: memref<8x32xf32, #tpu.memory_space<vmem>>, %arg16: memref<8x1xf32, #tpu.memory_space<vmem>>) attributes {dimension_semantics = [#tpu.dimension_semantics<parallel>, #tpu.dimension_semantics<arbitrary>], iteration_bounds = array<i64: 2, 1>, scalar_prefetch = 0 : i64, scratch_operands = 2 : i64, tpu.core_type = #tpu.core_type<tc>, window_params = [{transform_indices = @transform_0, window_bounds = array<i64: 1, 32, 256>}, {transform_indices = @transform_1, window_bounds = array<i64: 1, 8, 256>}, {transform_indices = @transform_2, window_bounds = array<i64: 1, 8, 32>}, {pipeline_mode = #tpu.pipeline_mode<synchronous>, transform_indices = @transform_3, window_bounds = array<i64: 32, 32>}, {pipeline_mode = #tpu.pipeline_mode<synchronous>, transform_indices = @transform_4, window_bounds = array<i64: 1, 32>}, {pipeline_mode = #tpu.pipeline_mode<synchronous>, transform_indices = @transform_5, window_bounds = array<i64: 32, 32>}, {pipeline_mode = #tpu.pipeline_mode<synchronous>, transform_indices = @transform_6, window_bounds = array<i64: 1, 32>}, {pipeline_mode = #tpu.pipeline_mode<synchronous>, transform_indices = @transform_7, window_bounds = array<i64: 32, 32>}, {pipeline_mode = #tpu.pipeline_mode<synchronous>, transform_indices = @transform_8, window_bounds = array<i64: 1, 32>}, {pipeline_mode = #tpu.pipeline_mode<synchronous>, transform_indices = @transform_9, window_bounds = array<i64: 32, 32>}, {pipeline_mode = #tpu.pipeline_mode<synchronous>, transform_indices = @transform_10, window_bounds = array<i64: 1, 32>}, {transform_indices = @transform_11, window_bounds = array<i64: 1, 8, 32>}, {transform_indices = @transform_12, window_bounds = array<i64: 1, 8, 32>}]} {
    %c0_i32 = arith.constant 0 : i32
    %0 = arith.cmpi eq, %arg1, %c0_i32 : i32
    %1 = arith.extui %0 : i1 to i32
    %c0_i32_0 = arith.constant 0 : i32
    %2 = arith.cmpi ne, %1, %c0_i32_0 : i32
    scf.if %2 {
      %cst_18 = arith.constant 0.000000e+00 : f32
      %23 = vector.broadcast %cst_18 : f32 to vector<8x32xf32>
      %c0_19 = arith.constant 0 : index
      %c0_20 = arith.constant 0 : index
      %24 = vector.load %arg15[%c0_19, %c0_20] : memref<8x32xf32, #tpu.memory_space<vmem>>, vector<8x32xf32>
      tpu.vector_store %arg15[%c0_19, %c0_20], %23 {strides = array<i32>} : memref<8x32xf32, #tpu.memory_space<vmem>>, vector<8x32xf32>,
      %cst_21 = arith.constant 0.000000e+00 : f32
      %25 = vector.broadcast %cst_21 : f32 to vector<8x1xf32>
      %c0_22 = arith.constant 0 : index
      %c0_23 = arith.constant 0 : index
      %26 = vector.load %arg16[%c0_22, %c0_23] : memref<8x1xf32, #tpu.memory_space<vmem>>, vector<8x1xf32>
      tpu.vector_store %arg16[%c0_22, %c0_23], %25 {strides = array<i32>} : memref<8x1xf32, #tpu.memory_space<vmem>>, vector<8x1xf32>,
      %cst_24 = arith.constant 0.000000e+00 : f32
      %27 = vector.broadcast %cst_24 : f32 to vector<1x8x32xf32>
      %c0_25 = arith.constant 0 : index
      %c0_26 = arith.constant 0 : index
      %c0_27 = arith.constant 0 : index
      %28 = vector.load %arg13[%c0_25, %c0_26, %c0_27] : memref<1x8x32xf32, #tpu.memory_space<vmem>>, vector<1x8x32xf32>
      tpu.vector_store %arg13[%c0_25, %c0_26, %c0_27], %27 {strides = array<i32>} : memref<1x8x32xf32, #tpu.memory_space<vmem>>, vector<1x8x32xf32>,
      %cst_28 = arith.constant 0.000000e+00 : f32
      %29 = vector.broadcast %cst_28 : f32 to vector<1x8x32xf32>
      %c0_29 = arith.constant 0 : index
      %c0_30 = arith.constant 0 : index
      %c0_31 = arith.constant 0 : index
      %30 = vector.load %arg14[%c0_29, %c0_30, %c0_31] : memref<1x8x32xf32, #tpu.memory_space<vmem>>, vector<1x8x32xf32>
      tpu.vector_store %arg14[%c0_29, %c0_30, %c0_31], %29 {strides = array<i32>} : memref<1x8x32xf32, #tpu.memory_space<vmem>>, vector<1x8x32xf32>,
    } else {
    }
    %c0 = arith.constant 0 : index
    %c0_1 = arith.constant 0 : index
    %c0_2 = arith.constant 0 : index
    %3 = vector.load %arg3[%c0, %c0_1, %c0_2] : memref<1x8x256xf32, #tpu.memory_space<vmem>>, vector<1x8x256xf32>
    %4 = vector.shape_cast %3 : vector<1x8x256xf32> to vector<8x256xf32>
    %cst = arith.constant 0.000000e+00 : f32
    %5 = vector.broadcast %cst : f32 to vector<8x256xf32>
    %6 = arith.cmpf ogt, %4, %5 : vector<8x256xf32>
    %7 = arith.extui %6 : vector<8x256xi1> to vector<8x256xi32>
    %8 = arith.sitofp %7 : vector<8x256xi32> to vector<8x256xf32>
    %c0_3 = arith.constant 0 : index
    %c0_4 = arith.constant 0 : index
    %c0_5 = arith.constant 0 : index
    %9 = vector.load %arg2[%c0_3, %c0_4, %c0_5] : memref<1x32x256xf32, #tpu.memory_space<vmem>>, vector<1x32x256xf32>
    %10 = vector.shape_cast %9 : vector<1x32x256xf32> to vector<32x256xf32>
    %c0_6 = arith.constant 0 : index
    %c0_7 = arith.constant 0 : index
    %11 = vector.load %arg16[%c0_6, %c0_7] : memref<8x1xf32, #tpu.memory_space<vmem>>, vector<8x1xf32>
    %cst_8 = arith.constant dense<0.000000e+00> : vector<8xf32>
    %12 = vector.multi_reduction <add>, %8, %cst_8 [1] : vector<8x256xf32> to vector<8xf32>
    %13 = vector.shape_cast %12 : vector<8xf32> to vector<8x1xf32>
    %14 = arith.addf %11, %13 : vector<8x1xf32>
    %c0_9 = arith.constant 0 : index
    %c0_10 = arith.constant 0 : index
    %15 = vector.load %arg16[%c0_9, %c0_10] : memref<8x1xf32, #tpu.memory_space<vmem>>, vector<8x1xf32>
    tpu.vector_store %arg16[%c0_9, %c0_10], %14 {strides = array<i32>} : memref<8x1xf32, #tpu.memory_space<vmem>>, vector<8x1xf32>,
    %c0_11 = arith.constant 0 : index
    %c0_12 = arith.constant 0 : index
    %16 = vector.load %arg15[%c0_11, %c0_12] : memref<8x32xf32, #tpu.memory_space<vmem>>, vector<8x32xf32>
    %cst_13 = arith.constant dense<0.000000e+00> : vector<8x32xf32>
    %17 = tpu.matmul %8, %10, %cst_13 {dimension_numbers = #tpu.dot_dimension_numbers<[1], [1], [0], [0], [0, 0, 1, 0], [], []>} : vector<8x256xf32>, vector<32x256xf32>, vector<8x32xf32> -> vector<8x32xf32>
    %18 = arith.addf %16, %17 : vector<8x32xf32>
    %c0_14 = arith.constant 0 : index
    %c0_15 = arith.constant 0 : index
    %19 = vector.load %arg15[%c0_14, %c0_15] : memref<8x32xf32, #tpu.memory_space<vmem>>, vector<8x32xf32>
    tpu.vector_store %arg15[%c0_14, %c0_15], %18 {strides = array<i32>} : memref<8x32xf32, #tpu.memory_space<vmem>>, vector<8x32xf32>,
    %c0_i32_16 = arith.constant 0 : i32
    %20 = arith.cmpi eq, %arg1, %c0_i32_16 : i32
    %21 = arith.extui %20 : i1 to i32
    %c0_i32_17 = arith.constant 0 : i32
    %22 = arith.cmpi ne, %21, %c0_i32_17 : i32
    scf.if %22 {
      %c0_18 = arith.constant 0 : index
      %c0_19 = arith.constant 0 : index
      %23 = vector.load %arg15[%c0_18, %c0_19] : memref<8x32xf32, #tpu.memory_space<vmem>>, vector<8x32xf32>
      %c0_20 = arith.constant 0 : index
      %c0_21 = arith.constant 0 : index
      %24 = vector.load %arg16[%c0_20, %c0_21] : memref<8x1xf32, #tpu.memory_space<vmem>>, vector<8x1xf32>
      %cst_22 = arith.constant 9.99999993E-9 : f32
      %25 = vector.broadcast %cst_22 : f32 to vector<8x1xf32>
      %26 = arith.addf %24, %25 : vector<8x1xf32>
      %cst_23 = arith.constant 1.000000e+00 : f32
      %27 = vector.broadcast %cst_23 : f32 to vector<8x1xf32>
      %28 = arith.divf %27, %26 : vector<8x1xf32>
      %29 = vector.broadcast %28 : vector<8x1xf32> to vector<8x32xf32>
      %30 = arith.mulf %23, %29 : vector<8x32xf32>
      %cst_24 = arith.constant dense<0.000000e+00> : vector<8xf32>
      %31 = vector.multi_reduction <add>, %30, %cst_24 [1] : vector<8x32xf32> to vector<8xf32>
      %32 = vector.shape_cast %31 : vector<8xf32> to vector<8x1xf32>
      %cst_25 = arith.constant 3.200000e+01 : f32
      %33 = vector.broadcast %cst_25 : f32 to vector<8x1xf32>
      %34 = arith.divf %32, %33 : vector<8x1xf32>
      %35 = vector.broadcast %34 : vector<8x1xf32> to vector<8x32xf32>
      %36 = arith.subf %30, %35 : vector<8x32xf32>
      %37 = arith.mulf %36, %36 : vector<8x32xf32>
      %cst_26 = arith.constant dense<0.000000e+00> : vector<8xf32>
      %38 = vector.multi_reduction <add>, %37, %cst_26 [1] : vector<8x32xf32> to vector<8xf32>
      %39 = vector.shape_cast %38 : vector<8xf32> to vector<8x1xf32>
      %cst_27 = arith.constant 3.200000e+01 : f32
      %40 = vector.broadcast %cst_27 : f32 to vector<8x1xf32>
      %41 = arith.divf %39, %40 : vector<8x1xf32>
      %42 = vector.broadcast %34 : vector<8x1xf32> to vector<8x32xf32>
      %43 = arith.subf %30, %42 : vector<8x32xf32>
      %cst_28 = arith.constant 9.99999974E-6 : f32
      %44 = vector.broadcast %cst_28 : f32 to vector<8x1xf32>
      %45 = arith.addf %41, %44 : vector<8x1xf32>
      %46 = math.rsqrt %45 : vector<8x1xf32>
      %47 = vector.broadcast %46 : vector<8x1xf32> to vector<8x32xf32>
      %48 = arith.mulf %43, %47 : vector<8x32xf32>
      %c0_29 = arith.constant 0 : index
      %c0_30 = arith.constant 0 : index
      %49 = vector.load %arg5[%c0_29, %c0_30] : memref<32x32xf32, #tpu.memory_space<vmem>>, vector<32x32xf32>
      %cst_31 = arith.constant dense<0.000000e+00> : vector<8x32xf32>
      %50 = tpu.matmul %48, %49, %cst_31 {dimension_numbers = #tpu.dot_dimension_numbers<[1], [0], [0], [1], [0, 0, 1, 1], [], []>} : vector<8x32xf32>, vector<32x32xf32>, vector<8x32xf32> -> vector<8x32xf32>
      %c0_32 = arith.constant 0 : index
      %c0_33 = arith.constant 0 : index
      %51 = vector.load %arg6[%c0_32, %c0_33] : memref<1x32xf32, #tpu.memory_space<vmem>>, vector<1x32xf32>
      %52 = vector.broadcast %51 : vector<1x32xf32> to vector<8x32xf32>
      %53 = arith.addf %50, %52 : vector<8x32xf32>
      %c0_34 = arith.constant 0 : index
      %c0_35 = arith.constant 0 : index
      %c0_36 = arith.constant 0 : index
      %54 = vector.load %arg4[%c0_34, %c0_35, %c0_36] : memref<1x8x32xf32, #tpu.memory_space<vmem>>, vector<1x8x32xf32>
      %55 = vector.shape_cast %54 : vector<1x8x32xf32> to vector<8x32xf32>
      %56 = arith.addf %53, %55 : vector<8x32xf32>
      %c0_37 = arith.constant 0 : index
      %c0_38 = arith.constant 0 : index
      %c0_39 = arith.constant 0 : index
      %57 = vector.load %arg13[%c0_37, %c0_38, %c0_39] : memref<1x8x32xf32, #tpu.memory_space<vmem>>, vector<1x8x32xf32>
      %58 = vector.shape_cast %57 : vector<1x8x32xf32> to vector<8x32xf32>
      %59 = vector.shape_cast %56 : vector<8x32xf32> to vector<1x8x32xf32>
      tpu.vector_store %arg13[%c0_37, %c0_38, %c0_39], %59 {strides = array<i32>} : memref<1x8x32xf32, #tpu.memory_space<vmem>>, vector<1x8x32xf32>,
      %cst_40 = arith.constant dense<0.000000e+00> : vector<8xf32>
      %60 = vector.multi_reduction <add>, %56, %cst_40 [1] : vector<8x32xf32> to vector<8xf32>
      %61 = vector.shape_cast %60 : vector<8xf32> to vector<8x1xf32>
      %cst_41 = arith.constant 3.200000e+01 : f32
      %62 = vector.broadcast %cst_41 : f32 to vector<8x1xf32>
      %63 = arith.divf %61, %62 : vector<8x1xf32>
      %64 = vector.broadcast %63 : vector<8x1xf32> to vector<8x32xf32>
      %65 = arith.subf %56, %64 : vector<8x32xf32>
      %66 = arith.mulf %65, %65 : vector<8x32xf32>
      %cst_42 = arith.constant dense<0.000000e+00> : vector<8xf32>
      %67 = vector.multi_reduction <add>, %66, %cst_42 [1] : vector<8x32xf32> to vector<8xf32>
      %68 = vector.shape_cast %67 : vector<8xf32> to vector<8x1xf32>
      %cst_43 = arith.constant 3.200000e+01 : f32
      %69 = vector.broadcast %cst_43 : f32 to vector<8x1xf32>
      %70 = arith.divf %68, %69 : vector<8x1xf32>
      %71 = vector.broadcast %63 : vector<8x1xf32> to vector<8x32xf32>
      %72 = arith.subf %56, %71 : vector<8x32xf32>
      %cst_44 = arith.constant 9.99999974E-6 : f32
      %73 = vector.broadcast %cst_44 : f32 to vector<8x1xf32>
      %74 = arith.addf %70, %73 : vector<8x1xf32>
      %75 = math.rsqrt %74 : vector<8x1xf32>
      %76 = vector.broadcast %75 : vector<8x1xf32> to vector<8x32xf32>
      %77 = arith.mulf %72, %76 : vector<8x32xf32>
      %c0_45 = arith.constant 0 : index
      %c0_46 = arith.constant 0 : index
      %78 = vector.load %arg7[%c0_45, %c0_46] : memref<32x32xf32, #tpu.memory_space<vmem>>, vector<32x32xf32>
      %cst_47 = arith.constant dense<0.000000e+00> : vector<8x32xf32>
      %79 = tpu.matmul %77, %78, %cst_47 {dimension_numbers = #tpu.dot_dimension_numbers<[1], [0], [0], [1], [0, 0, 1, 1], [], []>} : vector<8x32xf32>, vector<32x32xf32>, vector<8x32xf32> -> vector<8x32xf32>
      %c0_48 = arith.constant 0 : index
      %c0_49 = arith.constant 0 : index
      %80 = vector.load %arg8[%c0_48, %c0_49] : memref<1x32xf32, #tpu.memory_space<vmem>>, vector<1x32xf32>
      %81 = vector.broadcast %80 : vector<1x32xf32> to vector<8x32xf32>
      %82 = arith.addf %79, %81 : vector<8x32xf32>
      %cst_50 = arith.constant 0.000000e+00 : f32
      %83 = vector.broadcast %cst_50 : f32 to vector<8x32xf32>
      %84 = arith.maximumf %82, %83 : vector<8x32xf32>
      %c0_51 = arith.constant 0 : index
      %c0_52 = arith.constant 0 : index
      %85 = vector.load %arg9[%c0_51, %c0_52] : memref<32x32xf32, #tpu.memory_space<vmem>>, vector<32x32xf32>
      %cst_53 = arith.constant dense<0.000000e+00> : vector<8x32xf32>
      %86 = tpu.matmul %84, %85, %cst_53 {dimension_numbers = #tpu.dot_dimension_numbers<[1], [0], [0], [1], [0, 0, 1, 1], [], []>} : vector<8x32xf32>, vector<32x32xf32>, vector<8x32xf32> -> vector<8x32xf32>
      %c0_54 = arith.constant 0 : index
      %c0_55 = arith.constant 0 : index
      %87 = vector.load %arg10[%c0_54, %c0_55] : memref<1x32xf32, #tpu.memory_space<vmem>>, vector<1x32xf32>
      %88 = vector.broadcast %87 : vector<1x32xf32> to vector<8x32xf32>
      %89 = arith.addf %86, %88 : vector<8x32xf32>
      %cst_56 = arith.constant 0.000000e+00 : f32
      %90 = vector.broadcast %cst_56 : f32 to vector<8x32xf32>
      %91 = arith.maximumf %89, %90 : vector<8x32xf32>
      %c0_57 = arith.constant 0 : index
      %c0_58 = arith.constant 0 : index
      %92 = vector.load %arg11[%c0_57, %c0_58] : memref<32x32xf32, #tpu.memory_space<vmem>>, vector<32x32xf32>
      %cst_59 = arith.constant dense<0.000000e+00> : vector<8x32xf32>
      %93 = tpu.matmul %91, %92, %cst_59 {dimension_numbers = #tpu.dot_dimension_numbers<[1], [0], [0], [1], [0, 0, 1, 1], [], []>} : vector<8x32xf32>, vector<32x32xf32>, vector<8x32xf32> -> vector<8x32xf32>
      %c0_60 = arith.constant 0 : index
      %c0_61 = arith.constant 0 : index
      %94 = vector.load %arg12[%c0_60, %c0_61] : memref<1x32xf32, #tpu.memory_space<vmem>>, vector<1x32xf32>
      %95 = vector.broadcast %94 : vector<1x32xf32> to vector<8x32xf32>
      %96 = arith.addf %93, %95 : vector<8x32xf32>
      %c0_62 = arith.constant 0 : index
      %c0_63 = arith.constant 0 : index
      %c0_64 = arith.constant 0 : index
      %97 = vector.load %arg14[%c0_62, %c0_63, %c0_64] : memref<1x8x32xf32, #tpu.memory_space<vmem>>, vector<1x8x32xf32>
      %98 = vector.shape_cast %97 : vector<1x8x32xf32> to vector<8x32xf32>
      %99 = vector.shape_cast %96 : vector<8x32xf32> to vector<1x8x32xf32>
      tpu.vector_store %arg14[%c0_62, %c0_63, %c0_64], %99 {strides = array<i32>} : memref<1x8x32xf32, #tpu.memory_space<vmem>>, vector<1x8x32xf32>,
    } else {
    }
    return
  }
  func.func @transform_0(%arg0: i32, %arg1: i32) -> (i32, i32, i32) {
    %c0_i32 = arith.constant 0 : i32
    %c0_i32_0 = arith.constant 0 : i32
    return %arg0, %c0_i32, %arg1 : i32, i32, i32
  }
  func.func @transform_1(%arg0: i32, %arg1: i32) -> (i32, i32, i32) {
    %c0_i32 = arith.constant 0 : i32
    %c0_i32_0 = arith.constant 0 : i32
    return %arg0, %c0_i32, %arg1 : i32, i32, i32
  }
  func.func @transform_2(%arg0: i32, %arg1: i32) -> (i32, i32, i32) {
    %c0_i32 = arith.constant 0 : i32
    %c0_i32_0 = arith.constant 0 : i32
    %c0_i32_1 = arith.constant 0 : i32
    return %arg0, %c0_i32, %c0_i32_0 : i32, i32, i32
  }
  func.func @transform_3(%arg0: i32, %arg1: i32) -> (i32, i32) {
    %c0_i32 = arith.constant 0 : i32
    %c0_i32_0 = arith.constant 0 : i32
    %c0_i32_1 = arith.constant 0 : i32
    return %c0_i32, %c0_i32_0 : i32, i32
  }
  func.func @transform_4(%arg0: i32, %arg1: i32) -> (i32, i32) {
    %c0_i32 = arith.constant 0 : i32
    %c0_i32_0 = arith.constant 0 : i32
    %c0_i32_1 = arith.constant 0 : i32
    return %c0_i32, %c0_i32_0 : i32, i32
  }
  func.func @transform_5(%arg0: i32, %arg1: i32) -> (i32, i32) {
    %c0_i32 = arith.constant 0 : i32
    %c0_i32_0 = arith.constant 0 : i32
    %c0_i32_1 = arith.constant 0 : i32
    return %c0_i32, %c0_i32_0 : i32, i32
  }
  func.func @transform_6(%arg0: i32, %arg1: i32) -> (i32, i32) {
    %c0_i32 = arith.constant 0 : i32
    %c0_i32_0 = arith.constant 0 : i32
    %c0_i32_1 = arith.constant 0 : i32
    return %c0_i32, %c0_i32_0 : i32, i32
  }
  func.func @transform_7(%arg0: i32, %arg1: i32) -> (i32, i32) {
    %c0_i32 = arith.constant 0 : i32
    %c0_i32_0 = arith.constant 0 : i32
    %c0_i32_1 = arith.constant 0 : i32
    return %c0_i32, %c0_i32_0 : i32, i32
  }
  func.func @transform_8(%arg0: i32, %arg1: i32) -> (i32, i32) {
    %c0_i32 = arith.constant 0 : i32
    %c0_i32_0 = arith.constant 0 : i32
    %c0_i32_1 = arith.constant 0 : i32
    return %c0_i32, %c0_i32_0 : i32, i32
  }
  func.func @transform_9(%arg0: i32, %arg1: i32) -> (i32, i32) {
    %c0_i32 = arith.constant 0 : i32
    %c0_i32_0 = arith.constant 0 : i32
    %c0_i32_1 = arith.constant 0 : i32
    return %c0_i32, %c0_i32_0 : i32, i32
  }
  func.func @transform_10(%arg0: i32, %arg1: i32) -> (i32, i32) {
    %c0_i32 = arith.constant 0 : i32
    %c0_i32_0 = arith.constant 0 : i32
    %c0_i32_1 = arith.constant 0 : i32
    return %c0_i32, %c0_i32_0 : i32, i32
  }
  func.func @transform_11(%arg0: i32, %arg1: i32) -> (i32, i32, i32) {
    %c0_i32 = arith.constant 0 : i32
    %c0_i32_0 = arith.constant 0 : i32
    %c0_i32_1 = arith.constant 0 : i32
    return %arg0, %c0_i32, %c0_i32_0 : i32, i32, i32
  }
  func.func @transform_12(%arg0: i32, %arg1: i32) -> (i32, i32, i32) {
    %c0_i32 = arith.constant 0 : i32
    %c0_i32_0 = arith.constant 0 : i32
    %c0_i32_1 = arith.constant 0 : i32
    return %arg0, %c0_i32, %c0_i32_0 : i32, i32, i32
  }
}

</mosaic_0001>

<bundles_post_ra>
// kernel: tpu_custom_call.1
= control target key start
LH: loop header
LB: loop body
LE: loop exit
PB: predicated region body
PF: predicated region fallthrough
CT: control target
= control target key end

     0   :  { %s2482_s0 = inlined_call_operand.hbm [shape: f32[2,32,256], index: 0, kind: input, shape index: {}]   ;;  %s2483_s1 = inlined_call_operand.hbm [shape: f32[2,8,256], index: 1, kind: input, shape index: {}]   ;;  %s2484_s2 = inlined_call_operand.hbm [shape: f32[2,8,32], index: 2, kind: input, shape index: {}]   ;;  %s2485_s3 = inlined_call_operand.hbm [shape: f32[32,32], index: 3, kind: input, shape index: {}]   ;;  %s2486_s4 = inlined_call_operand.vmem [shape: f32[1,32], index: 4, kind: input, shape index: {}]   ;;  %s2487_s5 = inlined_call_operand.hbm [shape: f32[32,32], index: 5, kind: input, shape index: {}]   ;;  %s2488_s6 = inlined_call_operand.vmem [shape: f32[1,32], index: 6, kind: input, shape index: {}]   ;;  %s2489_s7 = inlined_call_operand.hbm [shape: f32[32,32], index: 7, kind: input, shape index: {}]   ;;  %s2490_s8 = inlined_call_operand.hbm [shape: f32[1,32], index: 8, kind: input, shape index: {}]   ;;  %s2491_s9 = inlined_call_operand.vmem [shape: f32[32,32], index: 9, kind: input, shape index: {}]   ;;  %s2492_s10 = inlined_call_operand.vmem [shape: f32[1,32], index: 10, kind: input, shape index: {}]   ;;  %s2493_s11 = inlined_call_operand.hbm [shape: f32[2,8,32], index: 11, kind: output, shape index: {0}]   ;;  %s2494_s12 = inlined_call_operand.hbm [shape: f32[2,8,32], index: 12, kind: output, shape index: {1}]  }
   0x1   :  { %2518 = sst [smem:[#allocation32_spill]] %s2483_s1 }
   0x2   :  { %2519 = sst [smem:[#allocation33_spill]] %s2485_s3 }
   0x3   :  { %2520 = sst [smem:[#allocation34_spill]] %s2488_s6 }
   0x4   :  { %2521 = sst [smem:[#allocation35_spill]] %s2489_s7 }
   0x5   :  { %2522 = sst [smem:[#allocation36_spill]] %s2492_s10 }
   0x6   :  { %2523 = sst [smem:[#allocation37_spill]] %s2493_s11 }
   0x7   :  { %2524 = sst [smem:[#allocation38_spill]] %s2494_s12 }
   0x8   :  { %18 = vsyncpa [#allocation5], 0 }
   0x9   :  { %20 = vsyncpa [#allocation5 + $0x1], 0 }
   0xa   :  { %21 = vsyncpa [#allocation8], 0 }
   0xb   :  { %23 = vsyncpa [#allocation8 + $0x1], 0 }
   0xc   :  { %24 = vsyncpa [#allocation11], 0 }
   0xd   :  { %25 = vsyncpa [#allocation14], 0 }
   0xe   :  { %26 = vsyncpa [#allocation6], 0 }
   0xf   :  { %28 = vsyncpa [#allocation6 + $0x1], 0 }
  0x10   :  { %29 = vsyncpa [#allocation18], 0 }
  0x11   :  { %31 = vsyncpa [#allocation18 + $0x1], 0  ;;  %s2001_s21 = smov 0   ;;  %s2003_s22 = smov 0  }
  0x12   :  { %s2005_s23 = smov 0   ;;  %s2007_s24 = smov 0  }
  0x13   :  { %s2009_s25 = smov 0   ;;  %s2011_s26 = smov 0  }
  0x14 LB: > { %2525 = sst [smem:[#allocation25_spill]] %s1896_s21  ;;  %s2032_s27 = sadd.s32 4294967295, %s1916_s26   ;;  %s1916_s26 = sphi %s2011_s26, %s37_s26   ;;  %s1912_s25 = sphi %s2009_s25, %s2574_s25   ;;  %s1908_s24 = sphi %s2007_s24, %s2573_s24   ;;  %s1904_s23 = sphi %s2005_s23, %s2569_s23   ;;  %s1900_s22 = sphi %s2003_s22, %s2572_s22   ;;  %s1896_s21 = sphi %s2001_s21, %s2571_s21  }
  0x15   : > { %2526 = sst [smem:[#allocation26_spill]] %s1904_s23  ;;  %p1314_p0 = scmp.ge.s32.totalorder %s1916_s26, 1 }
  0x16   : > { %2527 = sst [smem:[#allocation27_spill]] %s1908_s24  ;;  %p2498_p1 = scmp.eq.s32.totalorder %s2032_s27, 0 }
  0x17   : > { %2528 = sst [smem:[#allocation28_spill]] %s1916_s26  ;;  %p356_p2 = scmp.lt.s32.totalorder %s1916_s26, 3 }
  0x18   : > { %s1918_s29 = smov [#allocation10]   ;;  %s1919_s14 = smov [#allocation13]  }
  0x19   : > { %p2037_p3 = pnand %p1314_p0, %p356_p2  ;;  %s368_s30 = sshll.u32 %s1918_s29, 4  ;;  %s2041_s30 = int_to_ptr.vmem [resolvable:$true] %s368_s30 }
  0x1a   : > { %s400_s15 = sshll.u32 %s1919_s14, 4  ;;  %s2531_s3 = sld [smem:[#allocation33_spill]]  ;;  %s2052_s15 = int_to_ptr.vmem [resolvable:$true] %s400_s15 }
  0x1b   : > { %s2529_s28 = scalar_select %p2037_p3, 1, 0 }
  0x1c   : > { %p1480_p4 = pneg %p2037_p3 }
  0x1e   : > { %p2048_p6 = pnand %p1480_p4, %p2498_p1 }
  0x20   : > { %s2530_s13 = scalar_select %p2048_p6, 1, 0 }
  0x21   : > { %s1588_s18 = scalar_lea.hbm %s2531_s3, 512  ;;  %p2062_p8 = pneg %p2048_p6 }
  0x22   : > { %p1589_p7 = scmp.ne.s32.totalorder %s2531_s3, %s1588_s18  ;;  %p1595_p11 = scmp.lt.u32.totalorder %s1588_s18, %s2531_s3 }
  0x23   : > { %s2532_s29 = scalar_select %p2062_p8, 1, 0 }
  0x24   : > { %p1591_p9 = pnand %p2062_p8, %p1589_p7 }
  0x26   : > { %p1592_p10 = pneg %p1591_p9 }
  0x28   : > { %p1597_p12 = pnand %p1595_p11, %p1592_p10 }
  0x2a   : > { %1600 = shalt.err (!%p1597_p12)
}
  0x2b   : > { %s1601_s16 = scalar_lea.vmem %s2041_s30, 512  ;;  %p1609_p4 = scmp.lt.s32.totalorder %s2041_s30, %s2041_s30 }
  0x2c   : > { %p1602_p13 = scmp.ne.s32.totalorder %s2041_s30, %s1601_s16  ;;  %p1610_p5 = scmp.lt.s32.totalorder %s1601_s16, %s1601_s16 }
  0x2e   : > { %p1604_p0 = pnand %p1602_p13, %p2062_p8  ;;  %p1611_p7 = por %p1610_p5, %p1609_p4 }
  0x30   : > { %p1605_p2 = pneg %p1604_p0 }
  0x32   : > { %p1612_p9 = pnand %p1611_p7, %p1605_p2 }
  0x34   : > { %1615 = shalt.err (!%p1612_p9)
}
  0x35   : > { %s2499_s17 = smov 128   ;;  %s2500_s12 = smov 8  }
  0x36   : > { %1483 = dma.hbm_to_vmem [thread:$0]  (!%p2048_p6), %s2531_s3, 512, %s2041_s30, [#allocation11], %s2499_s17, %s2499_s17, %s2500_s12  }
  0x37   : > { %s2533_s7 = sld [smem:[#allocation35_spill]] }
  0x3d   : > { %s1616_s16 = scalar_lea.hbm %s2533_s7, 512 }
  0x3e   : > { %p1617_p5 = scmp.ne.s32.totalorder %s2533_s7, %s1616_s16  ;;  %p1623_p12 = scmp.lt.u32.totalorder %s1616_s16, %s2533_s7 }
  0x40   : > { %p1619_p10 = pnand %p1617_p5, %p2062_p8 }
  0x42   : > { %p1620_p11 = pneg %p1619_p10 }
  0x44   : > { %p1625_p13 = pnand %p1623_p12, %p1620_p11 }
  0x46   : > { %1628 = shalt.err (!%p1625_p13)
}
  0x47   : > { %s1629_s30 = scalar_lea.vmem %s2052_s15, 512  ;;  %p1637_p7 = scmp.lt.s32.totalorder %s2052_s15, %s2052_s15 }
  0x48   : > { %p1630_p0 = scmp.ne.s32.totalorder %s2052_s15, %s1629_s30  ;;  %p1638_p9 = scmp.lt.s32.totalorder %s1629_s30, %s1629_s30 }
  0x4a   : > { %p1632_p2 = pnand %p1630_p0, %p2062_p8  ;;  %p1639_p5 = por %p1638_p9, %p1637_p7 }
  0x4c   : > { %p1633_p4 = pneg %p1632_p2 }
  0x4e   : > { %p1640_p10 = pnand %p1639_p5, %p1633_p4 }
  0x50   : > { %1643 = shalt.err (!%p1640_p10)
}
  0x51   : > { %1489 = dma.hbm_to_vmem [thread:$0]  (!%p2048_p6), %s2533_s7, 512, %s2052_s15, [#allocation14], %s2499_s17, %s2499_s17, %s2500_s12  }
  0x52   : > { %s1313_s11 = sadd.s32 4294967294, %s1916_s26   ;;  %s49_s24 = sadd.s32 1, %s1912_s25 }
  0x53   : > { %p51_p11 = scmp.ge.s32.totalorder %s49_s24, 2  ;;  %s58_s18 = sadd.s32 1, %s1904_s23 }
  0x54   : > { %p65_p12 = scmp.ne.s32.totalorder %s1904_s23, %s1900_s22  ;;  %p66_p13 = scmp.eq.s32.totalorder %s1916_s26, 0 }
  0x55   : > { %s2576_s24 = smov (%p51_p11, %s49_s24), 0  ;;  %p71_p2 = scmp.ne.s32.totalorder %s1900_s22, %s1896_s21 }
  0x56   : > { %2534 = sst [smem:[#allocation29_spill]] %s2576_s24  ;;  %p2120_p0 = por %p66_p13, %p65_p12 }
  0x57   : > { %s53_s15 = ssub.s32 %s1912_s25, %s2576_s24  ;;  %p317_p4 = scmp.eq.s32.totalorder %s2032_s27, 1 }
  0x58   : > { %p56_p7 = scmp.eq.s32.totalorder %s53_s15, 0  ;;  %p2131_p9 = por %p2498_p1, %p71_p2 }
  0x59   : > { %p2135_p5 = por %p317_p4, %p65_p12  ;;  %p323_p10 = scmp.eq.s32.totalorder %s1313_s11, 1 }
  0x5a   : > { %s2536_s20 = scalar_select %p2131_p9, 1, 0 }
  0x5b   : > { %s2537_s14 = scalar_select %p2135_p5, 1, 0 }
  0x5c   : > { %s2140_s16 = scalar_select %p56_p7, %s1904_s23, %s58_s18  }
  0x5d   : > { %p2142_p11 = por %p323_p10, %p71_p2  ;;  %p1514_p13 = scmp.lt.s32.totalorder %s1916_s26, 2 }
  0x5e   : > { %2538 = sst [smem:[#allocation30_spill]] %s2140_s16  ;;  %s2148_s6 = sand.u32 1, %s1904_s23  }
  0x5f   : > { %s2539_s30 = scalar_select %p2142_p11, 1, 0 }
  0x60   : > { %s454_s10 = sand.u32 1, %s1916_s26   ;;  %p2153_p1 = pnand %p1514_p13, %p2120_p0 }
  0x61   : > { %2540 = sst [smem:[#allocation31_spill]] %s2539_s30  ;;  %s1323_s17 = sshll.u32 %s2148_s6, 4 }
  0x62   : > { %s2541_s15 = scalar_select %p2153_p1, 1, 0 }
  0x63   : > { %s1357_s12 = sshll.u32 %s1912_s25, 8  ;;  %s2542_s1 = sld [smem:[#allocation32_spill]] }
  0x64   : > { %s458_s7 = scalar_lea.vmem [#allocation7], %s1323_s17  ;;  %s2166_s19 = scalar_lea.sflag [#allocation8], %s454_s10 }
  0x65   : > { %s468_s24 = sshll.u32 %s458_s7, 4  ;;  %p2172_p0 = pneg %p2153_p1  ;;  %s2164_s24 = int_to_ptr.vmem [resolvable:$true] %s468_s24 }
  0x67   : > { %s2543_s23 = scalar_select %p2172_p0, 1, 0 }
  0x69   : > { %s2162_s3 = scalar_lea.hbm %s2542_s1, %s1357_s12  ;;  %s1649_s17 = scalar_lea.hbm %s2542_s1, 512 }
  0x6a   : > { %s1644_s16 = scalar_lea.hbm %s2162_s3, 256  ;;  %p1650_p7 = scmp.lt.u32.totalorder %s2162_s3, %s2542_s1 }
  0x6b   : > { %p1645_p12 = scmp.ne.s32.totalorder %s2162_s3, %s1644_s16  ;;  %p1651_p10 = scmp.lt.u32.totalorder %s1649_s17, %s1644_s16 }
  0x6c   : > { %p1653_p11 = scmp.lt.u32.totalorder %s1644_s16, %s2162_s3 }
  0x6d   : > { %p1647_p2 = pnand %p2172_p0, %p1645_p12  ;;  %p1652_p13 = por %p1651_p10, %p1650_p7 }
  0x6f   : > { %p1648_p4 = pneg %p1647_p2  ;;  %p1654_p5 = por %p1653_p11, %p1652_p13 }
  0x71   : > { %p1655_p9 = pnand %p1654_p5, %p1648_p4 }
  0x73   : > { %1658 = shalt.err (!%p1655_p9)
}
  0x74   : > { %s1659_s10 = scalar_lea.vmem %s2164_s24, 256  ;;  %s1922_s12 = smov [#allocation7]  }
  0x75   : > { %p1660_p12 = scmp.ne.s32.totalorder %s2164_s24, %s1659_s10  ;;  %s1664_s11 = sshll.u32 %s1922_s12, 4  ;;  %s1665_s11 = int_to_ptr.vmem [resolvable:$false] %s1664_s11 }
  0x76   : > { %s1666_s7 = scalar_lea.vmem %s1665_s11, 512  ;;  %p1667_p6 = scmp.lt.s32.totalorder %s2164_s24, %s1665_s11 }
  0x77   : > { %p1662_p2 = pnand %p1660_p12, %p2172_p0  ;;  %p1668_p8 = scmp.lt.s32.totalorder %s1666_s7, %s1659_s10 }
  0x79   : > { %p1663_p3 = pneg %p1662_p2  ;;  %p1669_p7 = por %p1668_p8, %p1667_p6 }
  0x7b   : > { %p1670_p10 = pnand %p1669_p7, %p1663_p3 }
  0x7d   : > { %1673 = shalt.err (!%p1670_p10)
}
  0x7e   : > { %1499 = dma.hbm_to_vmem [thread:$0]  (!%p2153_p1), %s2162_s3, 256, %s2164_s24, %s2166_s19  }
  0x7f   : > { %s1923_s16 = smov [#allocation12]   ;;  %s1924_s18 = smov [#allocation15]  }
  0x80   : > { %s384_s17 = sshll.u32 %s1923_s16, 4  ;;  %s414_s1 = sshll.u32 %s1924_s18, 4  ;;  %s385_s17 = int_to_ptr.vmem [resolvable:$true] %s384_s17  ;;  %s415_s1 = int_to_ptr.vmem [resolvable:$true] %s414_s1 }
  0x81   : > { %s1674_s11 = scalar_lea.hbm %s2487_s5, 512  ;;  %p2544_p6 = scmp.ne.s32.totalorder %s2532_s29, 0 }
  0x82   : > { %p1675_p3 = scmp.ne.s32.totalorder %s2487_s5, %s1674_s11  ;;  %p1681_p5 = scmp.lt.u32.totalorder %s1674_s11, %s2487_s5 }
  0x84   : > { %p1677_p8 = pnand %p1675_p3, %p2544_p6 }
  0x86   : > { %p1678_p9 = pneg %p1677_p8 }
  0x88   : > { %p1683_p11 = pnand %p1681_p5, %p1678_p9 }
  0x8a   : > { %1686 = shalt.err (!%p1683_p11)
}
  0x8b   : > { %s1687_s3 = scalar_lea.vmem %s385_s17, 512  ;;  %p1695_p2 = scmp.lt.s32.totalorder %s385_s17, %s385_s17 }
  0x8c   : > { %p1688_p4 = scmp.ne.s32.totalorder %s385_s17, %s1687_s3  ;;  %p1696_p7 = scmp.lt.s32.totalorder %s1687_s3, %s1687_s3 }
  0x8e   : > { %p1690_p13 = pnand %p1688_p4, %p2544_p6  ;;  %p1697_p10 = por %p1696_p7, %p1695_p2 }
  0x90   : > { %p1691_p12 = pneg %p1690_p13 }
  0x92   : > { %p1698_p1 = pnand %p1697_p10, %p1691_p12 }
  0x94   : > { %1701 = shalt.err (!%p1698_p1)
}
  0x95   : > { %p2545_p3 = scmp.ne.s32.totalorder %s2530_s13, 0  ;;  %s2546_s26 = smov 8  }
  0x96   : > { %s2547_s24 = smov 128   ;;  %s1702_s12 = scalar_lea.hbm %s2490_s8, 16 }
  0x97   : > { %1486 = dma.hbm_to_vmem [thread:$0]  (!%p2545_p3), %s2487_s5, 512, %s385_s17, [#allocation11], %s2547_s24, %s2547_s24, %s2546_s26  }
  0x98   : > { %p1703_p8 = scmp.ne.s32.totalorder %s2490_s8, %s1702_s12  ;;  %p1709_p5 = scmp.lt.u32.totalorder %s1702_s12, %s2490_s8 }
  0x9a   : > { %p1705_p1 = pnand %p1703_p8, %p2544_p6 }
  0x9c   : > { %p1706_p9 = pneg %p1705_p1 }
  0x9e   : > { %p1711_p11 = pnand %p1709_p5, %p1706_p9 }
  0xa0   : > { %1714 = shalt.err (!%p1711_p11)
}
  0xa1   : > { %s1715_s21 = scalar_lea.vmem %s415_s1, 16  ;;  %s1722_s17 = scalar_lea.vmem %s415_s1, 32 }
  0xa2   : > { %p1716_p4 = scmp.ne.s32.totalorder %s415_s1, %s1715_s21  ;;  %p1723_p2 = scmp.lt.s32.totalorder %s415_s1, %s415_s1 }
  0xa3   : > { %p1724_p7 = scmp.lt.s32.totalorder %s1722_s17, %s1715_s21 }
  0xa4   : > { %p1718_p13 = pnand %p1716_p4, %p2544_p6 }
  0xa5   : > { %p1725_p10 = por %p1724_p7, %p1723_p2 }
  0xa6   : > { %p1719_p12 = pneg %p1718_p13 }
  0xa8   : > { %p1726_p0 = pnand %p1725_p10, %p1719_p12 }
  0xaa   : > { %1729 = shalt.err (!%p1726_p0)
}
  0xab   : > { %1492 = dma.hbm_to_vmem [thread:$0]  (!%p2545_p3), %s2490_s8, 16, %s415_s1, [#allocation14]  }
  0xac   : > { %s1320_s30 = sshll.u32 %s2148_s6, 6  ;;  %s1356_s29 = sshll.u32 %s1912_s25, 10 }
  0xad   : > { %s2240_s12 = scalar_lea.hbm %s2482_s0, %s1356_s29  ;;  %s435_s13 = scalar_lea.vmem [#allocation4], %s1320_s30 }
  0xae   : > { %s444_s11 = sshll.u32 %s435_s13, 4  ;;  %s432_s10 = scalar_lea.sflag [#allocation5], %s2148_s6  ;;  %s2242_s11 = int_to_ptr.vmem [resolvable:$true] %s444_s11 }
  0xaf   : > { %s1730_s7 = scalar_lea.hbm %s2240_s12, 1024  ;;  %p2548_p6 = scmp.ne.s32.totalorder %s2543_s23, 0 }
  0xb0   : > { %p1731_p0 = scmp.ne.s32.totalorder %s2240_s12, %s1730_s7  ;;  %s1735_s21 = scalar_lea.hbm %s2482_s0, 2048 }
  0xb1   : > { %p1736_p1 = scmp.lt.u32.totalorder %s2240_s12, %s2482_s0  ;;  %p1737_p9 = scmp.lt.u32.totalorder %s1735_s21, %s1730_s7 }
  0xb2   : > { %p1733_p3 = pnand %p1731_p0, %p2548_p6  ;;  %p1739_p11 = scmp.lt.u32.totalorder %s1730_s7, %s2240_s12 }
  0xb3   : > { %p1738_p5 = por %p1737_p9, %p1736_p1 }
  0xb4   : > { %p1734_p8 = pneg %p1733_p3 }
  0xb5   : > { %p1740_p4 = por %p1739_p11, %p1738_p5 }
  0xb7   : > { %p1741_p13 = pnand %p1740_p4, %p1734_p8 }
  0xb9   : > { %1744 = shalt.err (!%p1741_p13)
}
  0xba   : > { %s1745_s24 = scalar_lea.vmem %s2242_s11, 1024  ;;  %s1925_s30 = smov [#allocation4]  }
  0xbb   : > { %p1746_p12 = scmp.ne.s32.totalorder %s2242_s11, %s1745_s24  ;;  %s1750_s29 = sshll.u32 %s1925_s30, 4  ;;  %s1751_s29 = int_to_ptr.vmem [resolvable:$false] %s1750_s29 }
  0xbc   : > { %s1752_s16 = scalar_lea.vmem %s1751_s29, 2048  ;;  %p1753_p10 = scmp.lt.s32.totalorder %s2242_s11, %s1751_s29 }
  0xbd   : > { %p1748_p2 = pnand %p1746_p12, %p2548_p6  ;;  %p1754_p0 = scmp.lt.s32.totalorder %s1752_s16, %s1745_s24 }
  0xbf   : > { %p1749_p7 = pneg %p1748_p2  ;;  %p1755_p3 = por %p1754_p0, %p1753_p10 }
  0xc1   : > { %p1756_p1 = pnand %p1755_p3, %p1749_p7 }
  0xc3   : > { %1759 = shalt.err (!%p1756_p1)
}
  0xc4   : > { %s1926_s18 = smov 256   ;;  %s1927_s13 = smov 16  }
  0xc5   : > { %p2549_p8 = scmp.ne.s32.totalorder %s2541_s15, 0  ;;  %s1326_s7 = sshll.u32 %s2148_s6, 3 }
  0xc6   : > { %s1327_s1 = sshll.u32 %s1912_s25, 7  ;;  %s479_s26 = scalar_lea.vmem [#allocation9], %s1326_s7 }
  0xc7   : > { %1496 = dma.hbm_to_vmem [thread:$0]  (!%p2549_p8), %s2240_s12, 1024, %s2242_s11, %s432_s10, %s1926_s18, %s1926_s18, %s1927_s13  }
  0xc8   : > { %s2273_s17 = scalar_lea.hbm %s2484_s2, %s1327_s1  ;;  %s486_s24 = sshll.u32 %s479_s26, 4  ;;  %s487_s24 = int_to_ptr.vmem [resolvable:$true] %s486_s24 }
  0xc9   : > { %s1760_s30 = scalar_lea.hbm %s2273_s17, 128  ;;  %s1765_s11 = scalar_lea.hbm %s2484_s2, 256 }
  0xca   : > { %p1761_p9 = scmp.ne.s32.totalorder %s2273_s17, %s1760_s30  ;;  %p1766_p4 = scmp.lt.u32.totalorder %s2273_s17, %s2484_s2 }
  0xcb   : > { %p1767_p13 = scmp.lt.u32.totalorder %s1765_s11, %s1760_s30  ;;  %p1769_p2 = scmp.lt.u32.totalorder %s1760_s30, %s2273_s17 }
  0xcc   : > { %p1763_p5 = pnand %p1761_p9, %p2548_p6 }
  0xcd   : > { %p1768_p12 = por %p1767_p13, %p1766_p4 }
  0xce   : > { %p1764_p11 = pneg %p1763_p5 }
  0xcf   : > { %p1770_p7 = por %p1769_p2, %p1768_p12 }
  0xd1   : > { %p1771_p10 = pnand %p1770_p7, %p1764_p11 }
  0xd3   : > { %1774 = shalt.err (!%p1771_p10)
}
  0xd4   : > { %s1775_s16 = scalar_lea.vmem %s487_s24, 128  ;;  %s1928_s18 = smov [#allocation9]  }
  0xd5   : > { %p1776_p0 = scmp.ne.s32.totalorder %s487_s24, %s1775_s16  ;;  %s1780_s13 = sshll.u32 %s1928_s18, 4  ;;  %s1781_s13 = int_to_ptr.vmem [resolvable:$false] %s1780_s13 }
  0xd6   : > { %s1782_s7 = scalar_lea.vmem %s1781_s13, 256  ;;  %p1783_p9 = scmp.lt.s32.totalorder %s487_s24, %s1781_s13 }
  0xd7   : > { %p1778_p3 = pnand %p1776_p0, %p2548_p6  ;;  %p1784_p5 = scmp.lt.s32.totalorder %s1782_s7, %s1775_s16 }
  0xd9   : > { %p1779_p1 = pneg %p1778_p3  ;;  %p1785_p8 = por %p1784_p5, %p1783_p9 }
  0xdb   : > { %p1786_p4 = pnand %p1785_p8, %p1779_p1 }
  0xdd   : > { %1789 = shalt.err (!%p1786_p4)
}
  0xde   : > { %p2550_p13 = scmp.ne.s32.totalorder %s2541_s15, 0  ;;  %p2551_p11 = scmp.ne.s32.totalorder %s2529_s28, 0 }
  0xdf   : > { %s2296_s23 = sand.u32 (!%p2551_p11), 1, %s1900_s22   ;;  %p2552_p6 = scmp.ne.s32.totalorder (!%p2551_p11), %s2536_s20, 0 }
  0xe0   : > { %1502 = dma.hbm_to_vmem [thread:$0]  (!%p2550_p13), %s2273_s17, 128, %s487_s24, %s2166_s19  }
  0xe1   : > { %495 = sbr.rel (%p2551_p11) target bundleno = 2036 (0x7f4), region = 64  ;;  %s1329_s1 = sshll.u32 (!%p2551_p11), %s2296_s23, 6 }
  0xe2   : > { %s498_s3 = scalar_lea.sflag (!%p2551_p11), [#allocation5], %s2296_s23  ;;  %s2300_s21 = scalar_lea.vmem (!%p2551_p11), [#allocation4], %s1329_s1 }
  0xe8   : > { %1871 = dma.done.wait (%p2552_p6), %s498_s3, 1024  }
  0xe9   : > { %1873 = vsyncadd (%p2552_p6), %s498_s3, 4294966272  ;;  %s506_s28 = sand.u32 1, %s2032_s27   ;;  %s1330_s15 = sshll.u32 %s2296_s23, 4 }
  0xea   : > { %s507_s19 = scalar_lea.sflag [#allocation8], %s506_s28  ;;  %s510_s17 = scalar_lea.vmem [#allocation7], %s1330_s15 }
  0xeb   : > { %1875 = dma.done.wait (%p2552_p6), %s507_s19, 384  }
  0xec   : > { %1877 = vsyncadd (%p2552_p6), %s507_s19, 4294966912  ;;  %s2313_s26 = sshll.u32 %s2296_s23, 3  ;;  %p2553_p8 = scmp.eq.s32.totalorder %s2032_s27, 0 }
  0xed   : > { %s519_s24 = scalar_lea.vmem [#allocation9], %s2313_s26 }
  0xee   : > { %1879 = dma.done.wait (%p2553_p8), [#allocation11], 1024   ;;  %p2554_p12 = pmov %p2553_p8 }
  0xef   : > { %p2555_p2 = pmov %p2553_p8 }
  0xf0   : > { %1881 = vsyncadd (%p2554_p12), [#allocation11], 4294966272 }
  0xf1   : > { %1883 = dma.done.wait (%p2555_p2), [#allocation14], 528   ;;  %p2556_p7 = pmov %p2555_p2 }
  0xf2   : > { %vm599_vm0 = vcmask 7168   ;;  %v1929_v0 = vmov 0.0   ;;  %v603_v1 = vld [vmem:[%s510_s17] sm:$0xff]  ;;  %v604_v2 = vld [vmem:[%s510_s17 + $0x8] sm:$0xff]  ;;  %v1930_v13 = vmov 1.0   ;;  %v1931_v19 = vmov 0  }
  0xf3   : > { %1885 = vsyncadd (%p2556_p7), [#allocation14], 4294966768  ;;  %600 = vst.msk [vmem:[#allocation3] sm:$0xff] %vm599_vm0, %v1929_v0  ;;  %v612_v3 = vld [vmem:[%s2300_s21 + $0x8] sm:$0xff]  ;;  %vm605_vm1 = vcmp.gt.f32.partialorder %v603_v1, 0.0  ;;  %vm606_vm2 = vcmp.gt.f32.partialorder %v604_v2, 0.0  ;;  %1581 = vset.pattern.permute.xlu0 %v1931_v19 }
  0xf4   : > { %v614_v4 = vld [vmem:[%s2300_s21 + $0x18] sm:$0xff]  ;;  %v611_v5 = vld [vmem:[%s2300_s21] sm:$0xff]  ;;  %v613_v6 = vld [vmem:[%s2300_s21 + $0x10] sm:$0xff]  ;;  %v1338_v7 = vsel %vm605_vm1, 1.0, %v1929_v0  ;;  %v1339_v8 = vsel %vm606_vm2, 1.0, %v1929_v0  ;;  %1340 = vmatprep.mubr.msk.f32.mxu0 %vm606_vm2, %v1930_v13  ;;  %vm597_vm3 = vcmask 261120  }
  0xf5   : > { %v1422_v9 = vpack.c.bf16 %v614_v4, %v612_v3  ;;  %v1424_v10 = vpack.c.bf16 %v613_v6, %v611_v5  ;;  %v616_v11 = vld [vmem:[%s2300_s21 + $0x28] sm:$0xff]  ;;  %v618_v12 = vld [vmem:[%s2300_s21 + $0x38] sm:$0xff]  ;;  %v620_v14 = vadd.f32 %v1339_v8, %v1338_v7  ;;  %v615_v16 = vld [vmem:[%s2300_s21 + $0x20] sm:$0xff]  ;;  %598 = vst.msk [vmem:[#allocation2] sm:$0xff] %vm597_vm3, %v1929_v0  ;;  %v1932_v42 = vmov 0.0|0.0   ;;  %s2356_s27 = scalar_lea.vmem [#allocation16], %s2313_s26 }
  0xf6   : > { %v1426_v15 = vpack.c.bf16 %v618_v12, %v616_v11  ;;  %v617_v17 = vld [vmem:[%s2300_s21 + $0x30] sm:$0xff]  ;;  %v729_v40 = vld [vmem:[#allocation10 + $0x8] sm:$0xff]  ;;  %v730_v41 = vld [vmem:[#allocation10 + $0x10] sm:$0xff]  ;;  %1430 = vmatprep.subr.bf16.mxu1 %v1932_v42  ;;  %vm1933_vm4 = vmmov 0   ;;  %601 = vst.msk [vmem:[%s2356_s27] sm:$0xff] %vm597_vm3, %v1929_v0  ;;  %s2557_s18 = sld [smem:[#allocation34_spill]] }
  0xf7   : > { %1423 = vmatprep.subr.bf16.mxu0 %v1422_v9  ;;  %621 = vadd.xlane.f32.xlu0 %v620_v14  ;;  %v1428_v18 = vpack.c.bf16 %v617_v17, %v615_v16  ;;  %v728_v39 = vld [vmem:[#allocation10] sm:$0xff]  ;;  %v731_v44 = vld [vmem:[#allocation10 + $0x18] sm:$0xff]  ;;  %v829_v1 = vld [vmem:[#allocation12 + $0x8] sm:$0xff]  ;;  %s2558_s13 = sld [smem:[#allocation27_spill]]  ;;  %s2559_s17 = sld [smem:[#allocation37_spill]] }
  0xf8   : > { %1425 = vmatpush1.bf16.xpose.msra.mxu0 %v1424_v10  ;;  %v1431_v43 = vpack.c.bf16 %v729_v40, %v728_v39  ;;  %1386 = vmatprep.mubr.msk.f32.mxu1 %vm1933_vm4, %v1929_v0  ;;  %v1434_v45 = vpack.c.bf16 %v731_v44, %v730_v41  ;;  %v1342_v51 = vld [vmem:[%s2486_s4] ss:$0 sm:$0xff]  ;;  %v812_v53 = vld [vmem:[%s519_s24] sm:$0xff]  ;;  %v914_v7 = vld [vmem:[#allocation13 + $0x8] sm:$0xff]  ;;  %s1102_s20 = sshll.u32 %s2356_s27, 4  ;;  %s1084_s30 = scalar_lea.sflag [#allocation6], %s2296_s23  ;;  %s1103_s20 = int_to_ptr.vmem [resolvable:$true] %s1102_s20 }
  0xf9   : > { %1427 = vmatprep.subr.bf16.mxu0 %v1426_v15  ;;  %v828_v63 = vld [vmem:[#allocation12] sm:$0xff]  ;;  %v830_v3 = vld [vmem:[#allocation12 + $0x10] sm:$0xff]  ;;  %v831_v4 = vld [vmem:[#allocation12 + $0x18] sm:$0xff]  ;;  %s1790_s12 = scalar_lea.vmem %s1103_s20, 128  ;;  %p2560_p0 = scmp.ne.s32.totalorder %s2537_s14, 0 }
  0xfa   : > { %v619_v20 = vld [vmem:[#allocation3] sm:$0xff]  ;;  %1432 = vmatpush3.bf16.msra.mxu1 %v1431_v43  ;;  %v1437_v2 = vpack.c.bf16 %v829_v1, %v828_v63  ;;  %v1440_v5 = vpack.c.bf16 %v831_v4, %v830_v3  ;;  %v913_v6 = vld [vmem:[#allocation13] sm:$0xff]  ;;  %v915_v14 = vld [vmem:[#allocation13 + $0x10] sm:$0xff]  ;;  %p1791_p10 = scmp.ne.s32.totalorder %s1103_s20, %s1790_s12  ;;  %s1934_s6 = smov [#allocation16]  }
  0xfb   : > { %1433 = vmatprep.subr.bf16.mxu1 %v1932_v42  ;;  %v1443_v8 = vpack.c.bf16 %v914_v7, %v913_v6  ;;  %v916_v15 = vld [vmem:[#allocation13 + $0x18] sm:$0xff]  ;;  %v998_v17 = vld [vmem:[%s2491_s9] sm:$0xff]  ;;  %s1794_s11 = sshll.u32 %s1934_s6, 4  ;;  %s1795_s11 = int_to_ptr.vmem [resolvable:$false] %s1794_s11 }
  0xfc   : > { %v626_v26 = vld [vmem:[#allocation2] sm:$0xff]  ;;  %v1446_v16 = vpack.c.bf16 %v916_v15, %v915_v14  ;;  %p1792_p3 = pnand %p1791_p10, %p2560_p0  ;;  %s1796_s10 = scalar_lea.vmem %s1795_s11, 256 }
  0xfd   : > { %s1352_s28 = sshll.u32 %s2558_s13, 7  ;;  %p1797_p9 = scmp.lt.s32.totalorder %s1103_s20, %s1795_s11 }
  0xfe   : > { %1435 = vmatpush3.bf16.msra.mxu1 %v1434_v45  ;;  %s2400_s24 = scalar_lea.hbm %s2559_s17, %s1352_s28  ;;  %p1793_p1 = pneg %p1792_p3 }
  0xff   : > { %1436 = vmatprep.subr.bf16.mxu1 %v1932_v42  ;;  %p1798_p5 = scmp.lt.s32.totalorder %s1796_s10, %s1790_s12 }
 0x100   : > { %1429 = vmatpush1.bf16.xpose.msra.mxu0 %v1428_v18  ;;  %v999_v18 = vld [vmem:[%s2491_s9 + $0x8] sm:$0xff] }
 0x101   : > { %1442 = vmatprep.subr.bf16.mxu0 %v1932_v42  ;;  %v1449_v19 = vpack.c.bf16 %v999_v18, %v998_v17  ;;  %p1799_p4 = por %p1798_p5, %p1797_p9 }
 0x103   : > { %p1800_p13 = pnand %p1799_p4, %p1793_p1 }
 0x107   : > { %1341 = vmatmul.mubr.msk.f32.vlgmr.msra.gmra.mrb[0].mxu0 %vm605_vm1, %v1930_v13 }
 0x108   : > { %1408 = vmatprep.mubr.msk.f32.mxu0 %vm1933_vm4, %v1929_v0  ;;  %1444 = vmatpush3.bf16.msra.mxu0 %v1443_v8 }
 0x109   : > { %1445 = vmatprep.subr.bf16.mxu0 %v1932_v42 }
 0x10c   : > { %1447 = vmatpush3.bf16.msra.mxu0 %v1446_v16 }
 0x184   : > { %v622_v21 = vpop.xlane.xlu0 %621 }
 0x185   : > { %v623_v22 = vadd.f32 %v622_v21, %v619_v20  ;;  %v1344_v20 = vld [vmem:[%s2557_s18] ss:$0 sm:$0xff] }
 0x187   : > { %625 = vst.msk [vmem:[#allocation3] sm:$0xff] %vm599_vm0, %v623_v22 }
 0x18e   : > { %v704_v23 = vld [vmem:[#allocation3] sm:$0xff] }
 0x18f   : > { %v705_v24 = vadd.f32 1e-08, %v704_v23 }
 0x191   : > { %1582 = vrcp.f32 %v705_v24 }
 0x19b   : > { %v1583_v25 = vpop.eup %1582 }
 0x19c   : > { %710 = vperm.xlu0 %1581, %v1583_v25   ;;  %v1000_v25 = vld [vmem:[%s2491_s9 + $0x10] sm:$0xff] }
 0x1da   : > { %v693_v27 = vpop.f32.mrb[0].mxu0 }
 0x1db   : > { %v697_v28 = vadd.f32 %v693_v27, %v626_v26  ;;  %v695_v29 = vpop.f32.mrb[1].mxu0  ;;  %v1001_v26 = vld [vmem:[%s2491_s9 + $0x18] sm:$0xff] }
 0x1dc   : > { %v1452_v27 = vpack.c.bf16 %v1001_v26, %v1000_v25 }
 0x1dd   : > { %699 = vst.msk [vmem:[#allocation2] sm:$0xff] %vm597_vm3, %v697_v28  ;;  %v1346_v28 = vld [vmem:[#allocation15] ss:$0 sm:$0xff] }
 0x1e4   : > { %v703_v30 = vld [vmem:[#allocation2] sm:$0xff] }
 0x21b   : > { %v711_v31 = vpop.permute.xlu0 %710 }
 0x21c   : > { %v713_v32 = vmul.f32 %v711_v31, %v703_v30 }
 0x21e   : > { %v714_v33 = vsel %vm597_vm3, %v713_v32, 0.0 }
 0x21f   : > { %715 = vadd.xlane.f32.xlu1 %v714_v33 }
 0x2ac   : > { %v716_v34 = vpop.xlane.xlu1 %715 }
 0x2ad   : > { %v718_v35 = vmul.f32 0.03125, %v716_v34 }
 0x2af   : > { %v719_v36 = vsub.f32 %v713_v32, %v718_v35 }
 0x2b1   : > { %v720_v37 = vmul.f32 %v719_v36, %v719_v36 }
 0x2b3   : > { %v721_v38 = vsel %vm597_vm3, %v720_v37, 0.0 }
 0x2b4   : > { %722 = vadd.xlane.f32.xlu1 %v721_v38 }
 0x341   : > { %v723_v46 = vpop.xlane.xlu1 %722 }
 0x342   : > { %v724_v47 = vmul.f32 0.03125, %v723_v46 }
 0x344   : > { %v725_v48 = vadd.f32 1e-05, %v724_v47 }
 0x346   : > { %1584 = vrsqrt.f32 %v725_v48 }
 0x350   : > { %v1585_v49 = vpop.eup %1584 }
 0x351   : > { %v727_v50 = vmul.f32 %v1585_v49, %v719_v36 }
 0x353   : > { %1387 = vmatmul.mubr.msk.f32.vlgmr.msra.gmra.mrb[0].mxu1 %vm597_vm3, %v727_v50 }
 0x354   : > { %1397 = vmatprep.mubr.msk.f32.mxu1 %vm1933_vm4, %v1929_v0  ;;  %1438 = vmatpush3.bf16.msra.mxu1 %v1437_v2 }
 0x355   : > { %1439 = vmatprep.subr.bf16.mxu1 %v1932_v42 }
 0x358   : > { %1441 = vmatpush3.bf16.msra.mxu1 %v1440_v5 }
 0x359   : > { %1448 = vmatprep.subr.bf16.mxu1 %v1932_v42 }
 0x426   : > { %v808_v52 = vpop.f32.mrb[0].mxu1 }
 0x427   : > { %v809_v54 = vadd.f32 %v1342_v51, %v808_v52  ;;  %v1388_v55 = vpop.f32.mrb[1].mxu1 }
 0x429   : > { %v813_v56 = vadd.f32 %v812_v53, %v809_v54 }
 0x42b   : > { %v815_v57 = vsel %vm597_vm3, %v813_v56, 0.0  ;;  %814 = vst.msk [vmem:[%s2356_s27] sm:$0xff] %vm597_vm3, %v813_v56 }
 0x42c   : > { %816 = vadd.xlane.f32.xlu1 %v815_v57 }
 0x4b9   : > { %v817_v58 = vpop.xlane.xlu1 %816 }
 0x4ba   : > { %v818_v59 = vmul.f32 0.03125, %v817_v58 }
 0x4bc   : > { %v819_v60 = vsub.f32 %v813_v56, %v818_v59 }
 0x4be   : > { %v820_v61 = vmul.f32 %v819_v60, %v819_v60 }
 0x4c0   : > { %v821_v62 = vsel %vm597_vm3, %v820_v61, 0.0 }
 0x4c1   : > { %822 = vadd.xlane.f32.xlu1 %v821_v62 }
 0x54e   : > { %v823_v9 = vpop.xlane.xlu1 %822 }
 0x54f   : > { %v824_v10 = vmul.f32 0.03125, %v823_v9 }
 0x551   : > { %v825_v11 = vadd.f32 1e-05, %v824_v10 }
 0x553   : > { %1586 = vrsqrt.f32 %v825_v11 }
 0x55d   : > { %v1587_v12 = vpop.eup %1586 }
 0x55e   : > { %v827_v13 = vmul.f32 %v1587_v12, %v819_v60 }
 0x560   : > { %1398 = vmatmul.mubr.msk.f32.vlgmr.msra.gmra.mrb[2].mxu1 %vm597_vm3, %v827_v13 }
 0x561   : > { %1419 = vmatprep.mubr.msk.f32.mxu1 %vm1933_vm4, %v1929_v0  ;;  %1450 = vmatpush3.bf16.msra.mxu1 %v1449_v19 }
 0x562   : > { %1451 = vmatprep.subr.bf16.mxu1 %v1932_v42 }
 0x565   : > { %1453 = vmatpush3.bf16.msra.mxu1 %v1452_v27 }
 0x633   : > { %v908_v21 = vpop.f32.mrb[2].mxu1 }
 0x634   : > { %v909_v22 = vadd.f32 %v1344_v20, %v908_v21  ;;  %v1399_v23 = vpop.f32.mrb[3].mxu1 }
 0x636   : > { %v912_v24 = vmax.f32 %v909_v22, 0.0 }
 0x638   : > { %1409 = vmatmul.mubr.msk.f32.vlgmr.msra.gmra.mrb[2].mxu0 %vm597_vm3, %v912_v24 }
 0x70b   : > { %v993_v29 = vpop.f32.mrb[2].mxu0 }
 0x70c   : > { %v994_v30 = vadd.f32 %v1346_v28, %v993_v29  ;;  %v1410_v31 = vpop.f32.mrb[3].mxu0 }
 0x70e   : > { %v997_v32 = vmax.f32 %v994_v30, 0.0 }
 0x710   : > { %1420 = vmatmul.mubr.msk.f32.vlgmr.msra.gmra.mrb[4].mxu1 %vm597_vm3, %v997_v32 }
 0x711   : > { %1803 = shalt.err (!%p1800_p13)
}
 0x712   : > { %s1804_s27 = scalar_lea.hbm %s2400_s24, 128  ;;  %s1808_s18 = scalar_lea.hbm %s2559_s17, 256 }
 0x713   : > { %p1805_p11 = scmp.ne.s32.totalorder %s2400_s24, %s1804_s27  ;;  %p1809_p12 = scmp.lt.u32.totalorder %s2400_s24, %s2559_s17 }
 0x714   : > { %p1810_p2 = scmp.lt.u32.totalorder %s1808_s18, %s1804_s27  ;;  %p1812_p10 = scmp.lt.u32.totalorder %s1804_s27, %s2400_s24 }
 0x715   : > { %p1806_p6 = pnand %p1805_p11, %p2560_p0 }
 0x716   : > { %p1811_p7 = por %p1810_p2, %p1809_p12 }
 0x717   : > { %p1807_p8 = pneg %p1806_p6 }
 0x718   : > { %p1813_p3 = por %p1812_p10, %p1811_p7 }
 0x71a   : > { %p1814_p1 = pnand %p1813_p3, %p1807_p8 }
 0x71c   : > { %1817 = shalt.err (!%p1814_p1)
}
 0x71d   : > { %1476 = dma.vmem_to_hbm [thread:$0]  (%p2560_p0), %s1103_s20, 128, %s2400_s24, %s1084_s30  }
 0x71e   : > { %s590_s3 = scalar_lea.vmem [#allocation17], %s2313_s26  ;;  %s2561_s19 = sld [smem:[#allocation36_spill]] }
 0x71f   : > { %602 = vst.msk [vmem:[%s590_s3] sm:$0xff] %vm597_vm3, %v1929_v0  ;;  %s1115_s12 = sshll.u32 %s590_s3, 4  ;;  %s2562_s10 = sld [smem:[#allocation38_spill]]  ;;  %s2434_s12 = int_to_ptr.vmem [resolvable:$true] %s1115_s12 }
 0x720   : > { %s1089_s26 = scalar_lea.sflag [#allocation18], %s2296_s23  ;;  %s1818_s24 = scalar_lea.vmem %s2434_s12, 128 }
 0x721   : > { %p1819_p9 = scmp.ne.s32.totalorder %s2434_s12, %s1818_s24  ;;  %s1935_s20 = smov [#allocation17]  }
 0x722   : > { %s1822_s13 = sshll.u32 %s1935_s20, 4  ;;  %s1823_s13 = int_to_ptr.vmem [resolvable:$false] %s1822_s13 }
 0x723   : > { %p1820_p5 = pnand %p1819_p9, %p2560_p0  ;;  %s1824_s30 = scalar_lea.vmem %s1823_s13, 256 }
 0x724   : > { %v1348_v33 = vld [vmem:[%s2561_s19] ss:$0 sm:$0xff]  ;;  %p1825_p13 = scmp.lt.s32.totalorder %s2434_s12, %s1823_s13  ;;  %p1826_p11 = scmp.lt.s32.totalorder %s1824_s30, %s1818_s24 }
 0x725   : > { %s2432_s27 = scalar_lea.hbm %s2562_s10, %s1352_s28  ;;  %p1821_p4 = pneg %p1820_p5 }
 0x726   : > { %p1827_p6 = por %p1826_p11, %p1825_p13 }
 0x728   : > { %p1828_p8 = pnand %p1827_p6, %p1821_p4 }
 0x7e3   : > { %v1078_v34 = vpop.f32.mrb[4].mxu1 }
 0x7e4   : > { %v1079_v35 = vadd.f32 %v1348_v33, %v1078_v34  ;;  %v1421_v36 = vpop.f32.mrb[5].mxu1 }
 0x7e6   : > { %1082 = vst.msk [vmem:[%s590_s3] sm:$0xff] %vm597_vm3, %v1079_v35 }
 0x7e7   : > { %1831 = shalt.err (!%p1828_p8)
}
 0x7e8   : > { %s1832_s23 = scalar_lea.hbm %s2432_s27, 128  ;;  %s1836_s16 = scalar_lea.hbm %s2562_s10, 256 }
 0x7e9   : > { %p1833_p12 = scmp.ne.s32.totalorder %s2432_s27, %s1832_s23  ;;  %p1837_p10 = scmp.lt.u32.totalorder %s2432_s27, %s2562_s10 }
 0x7ea   : > { %p1838_p3 = scmp.lt.u32.totalorder %s1836_s16, %s1832_s23  ;;  %p1840_p9 = scmp.lt.u32.totalorder %s1832_s23, %s2432_s27 }
 0x7eb   : > { %p1834_p2 = pnand %p1833_p12, %p2560_p0 }
 0x7ec   : > { %p1839_p1 = por %p1838_p3, %p1837_p10 }
 0x7ed   : > { %p1835_p7 = pneg %p1834_p2 }
 0x7ee   : > { %p1841_p5 = por %p1840_p9, %p1839_p1 }
 0x7f0   : > { %p1842_p4 = pnand %p1841_p5, %p1835_p7 }
 0x7f2   : > { %1845 = shalt.err (!%p1842_p4)
}
 0x7f3   : > { %1477 = dma.vmem_to_hbm [thread:$0]  (%p2560_p0), %s2434_s12, 128, %s2432_s27, %s1089_s26  }
 0x7f4 PF: > { %s2563_s1 = sld [smem:[#allocation25_spill]]  ;;  %s2564_s3 = sld [smem:[#allocation31_spill]] }
 0x7f5   : > { %s2565_s21 = sld [smem:[#allocation28_spill]] }
 0x7fa   : > { %s1127_s15 = sand.u32 1, %s2563_s1   ;;  %p2566_p13 = scmp.ne.s32.totalorder %s2564_s3, 0 }
 0x7fb   : > { %p2567_p11 = scmp.ge.s32.totalorder %s2565_s21, 2  ;;  %s1128_s19 = scalar_lea.sflag [#allocation6], %s1127_s15 }
 0x7fd   : > { %p1504_p6 = pnand %p2567_p11, %p2566_p13 }
 0x7ff   : > { %1887 = dma.done.wait (!%p1504_p6), %s1128_s19, 128  }
 0x800   : > { %1889 = vsyncadd (!%p1504_p6), %s1128_s19, 4294967168  ;;  %s1137_s6 = scalar_lea.sflag [#allocation18], %s1127_s15 }
 0x801   : > { %1891 = dma.done.wait (!%p1504_p6), %s1137_s6, 128  }
 0x802   : > { %1893 = vsyncadd (!%p1504_p6), %s1137_s6, 4294967168  ;;  %s37_s26 = sadd.s32 1, %s2565_s21   ;;  %s2568_s14 = sld [smem:[#allocation26_spill]] }
 0x803   : > { %p34_p8 = scmp.ge.s32.totalorder %s37_s26, 4   ;;  %s2569_s23 = sld [smem:[#allocation30_spill]] }
 0x804   : > { %s2570_s12 = sld [smem:[#allocation29_spill]]  ;;  %s2571_s21 = smov %s1900_s22 }
 0x805   : > { %s2573_s24 = smov %s1912_s25  ;;  %36 = sbr.rel (!%p34_p8) target bundleno = 20 (0x14), region = 174 }
 0x808   : > { %s2572_s22 = smov %s2568_s14 }
 0x80a   : > { %s2574_s25 = smov %s2570_s12 }
 0x80c   :  { %1142 = vsyncpa [#allocation5], 1 }
 0x80d   :  { %1144 = vsyncpa [#allocation5 + $0x1], 1 }
 0x80e   :  { %1145 = vsyncpa [#allocation8], 1 }
 0x80f   :  { %1147 = vsyncpa [#allocation8 + $0x1], 1 }
 0x810   :  { %1148 = vsyncpa [#allocation11], 1 }
 0x811   :  { %1149 = vsyncpa [#allocation14], 1 }
 0x812   :  { %1150 = vsyncpa [#allocation6], 1 }
 0x813   :  { %1152 = vsyncpa [#allocation6 + $0x1], 1 }
 0x814   :  { %1153 = vsyncpa [#allocation18], 1 }
 0x815   :  { %1155 = vsyncpa [#allocation18 + $0x1], 1 }

</bundles_post_ra>
